<compile_context>
chip_gen: v5e
topology: v5e:2x2
jax: 0.10.0
libtpu: 0.0.40
codegen_flags: <defaults>
</compile_context>

<pallas_src>
import jax
import jax.numpy as jnp
from jax.experimental import pallas as pl
from jax.experimental.pallas import tpu as pltpu


def _make_cross_stitch_kernel(T):
    """Builds a kernel with T feature inputs and T outputs (T is static)."""

    def kernel(p_ref, *refs):
        # p_ref : (T, T, NC)   mixing weights, tiny, fully resident
        # refs  : T input refs of (NC, TILE) followed by T output refs (NC, TILE)
        x_refs = refs[:T]
        o_refs = refs[T:]
        w = p_ref[...].astype(jnp.float32)          # (T, T, NC), read once per step
        for i in range(T):                          # output tasks (unrolled, T small)
            acc = w[i, 0][:, None] * x_refs[0][...].astype(jnp.float32)
            for j in range(1, T):                   # input tasks (unrolled)
                acc = acc + w[i, j][:, None] * x_refs[j][...].astype(jnp.float32)
            o_refs[i][...] = acc.astype(o_refs[i].dtype)

    return kernel


def _pick_lane_tile(hw, target=2048):
    """Largest divisor of hw that is a multiple of 128 and <= target.
    Falls back to the full extent (block == full dim is always legal)."""
    if hw % 128 != 0:
        return hw
    cand = min(target, hw)
    cand -= cand % 128
    while cand >= 128 and hw % cand != 0:
        cand -= 128
    return cand if cand >= 128 else hw


def cross_stitch_unit(task_features, params, tasks, *, tile_hw=2048):
    """task_features: dict task -> [N, C, H, W] array (NCHW, like PyTorch).
    params: [T, T, C] array, params[i, j, c] mixes input task j into output i.
    Returns dict task -> [N, C, H, W]."""
    T = len(tasks)
    feats = [task_features[t] for t in tasks]
    N, C, H, W = feats[0].shape
    HW = H * W
    NC = N * C
    dtype = feats[0].dtype

    tile = _pick_lane_tile(HW, tile_hw)
    n_tiles = HW // tile

    # (N, C, H, W) -> (N*C, H*W): sublane-dense (N folded into C), lane-dense HW.
    xs = [f.reshape(NC, HW) for f in feats]

    # Expand the per-channel weights over the folded N*C sublane axis once in
    # the wrapper (index nc = n*C + c  ->  weight[c]); tiny array.
    params_nc = jnp.tile(params.astype(jnp.float32), (1, 1, N))      # (T, T, N*C)

    in_specs = [pl.BlockSpec((T, T, NC), lambda s: (0, 0, 0))]        # weights (resident)
    in_specs += [pl.BlockSpec((NC, tile), lambda s: (0, s)) for _ in range(T)]
    out_specs = [pl.BlockSpec((NC, tile), lambda s: (0, s)) for _ in range(T)]
    out_shape = tuple(jax.ShapeDtypeStruct((NC, HW), dtype) for _ in range(T))

    outs = pl.pallas_call(
        _make_cross_stitch_kernel(T),
        out_shape=out_shape,
        grid_spec=pltpu.PrefetchScalarGridSpec(
            num_scalar_prefetch=0,
            grid=(n_tiles,),
            in_specs=in_specs,
            out_specs=out_specs,
        ),
        compiler_params=pltpu.CompilerParams(
            dimension_semantics=("parallel",)),
    )(params_nc, *xs)

    return {t: o.reshape(N, C, H, W) for t, o in zip(tasks, outs)}


def make_cross_stitch_params(tasks, num_channels, alpha, beta, dtype=jnp.float32):
    """Deterministic init matching CrossStitchUnit.__init__: alpha on the
    diagonal (same task), beta off-diagonal, one scalar per channel."""
    T = len(tasks)
    eye = jnp.eye(T, dtype=dtype)[:, :, None]                         # (T, T, 1)
    p = alpha * eye + beta * (1.0 - eye)                              # (T, T, 1)
    return jnp.broadcast_to(p, (T, T, num_channels)).astype(dtype)


if __name__ == "__main__":
    tasks = ("semseg", "depth", "normals")
    N, C, H, W = 2, 4, 16, 16
    alpha, beta = 0.9, 0.1

    key = jax.random.PRNGKey(0)
    keys = jax.random.split(key, len(tasks))
    task_features = {
        t: jax.random.normal(k, (N, C, H, W), dtype=jnp.float32)
        for t, k in zip(tasks, keys)
    }

    params = make_cross_stitch_params(tasks, C, alpha, beta)

    out = cross_stitch_unit(task_features, params, tasks)
    jax.block_until_ready(out)

    # Pure-JAX reference check (mirrors the PyTorch forward).
    for i, t_i in enumerate(tasks):
        ref = jnp.zeros((N, C, H, W), jnp.float32)
        for j, t_j in enumerate(tasks):
            ref = ref + params[i, j][None, :, None, None] * task_features[t_j]
        assert jnp.allclose(out[t_i], ref, atol=1e-5, rtol=1e-5), f"mismatch for {t_i}"

    print("KERNEL_OK")
</pallas_src>

<mosaic_0001>
module attributes {stable_mosaic.version = 11 : i64} {
  func.func @kernel(%arg0: i32, %arg1: memref<3x3x8xf32, #tpu.memory_space<vmem>>, %arg2: memref<8x256xf32, #tpu.memory_space<vmem>>, %arg3: memref<8x256xf32, #tpu.memory_space<vmem>>, %arg4: memref<8x256xf32, #tpu.memory_space<vmem>>, %arg5: memref<8x256xf32, #tpu.memory_space<vmem>>, %arg6: memref<8x256xf32, #tpu.memory_space<vmem>>, %arg7: memref<8x256xf32, #tpu.memory_space<vmem>>) attributes {dimension_semantics = [#tpu.dimension_semantics<parallel>], iteration_bounds = array<i64: 1>, scalar_prefetch = 0 : i64, scratch_operands = 0 : i64, tpu.core_type = #tpu.core_type<tc>, window_params = [{pipeline_mode = #tpu.pipeline_mode<synchronous>, transform_indices = @transform_0, window_bounds = array<i64: 3, 3, 8>}, {transform_indices = @transform_1, window_bounds = array<i64: 8, 256>}, {transform_indices = @transform_2, window_bounds = array<i64: 8, 256>}, {transform_indices = @transform_3, window_bounds = array<i64: 8, 256>}, {transform_indices = @transform_4, window_bounds = array<i64: 8, 256>}, {transform_indices = @transform_5, window_bounds = array<i64: 8, 256>}, {transform_indices = @transform_6, window_bounds = array<i64: 8, 256>}]} {
    %c0 = arith.constant 0 : index
    %c0_0 = arith.constant 0 : index
    %c0_1 = arith.constant 0 : index
    %0 = vector.load %arg1[%c0, %c0_0, %c0_1] : memref<3x3x8xf32, #tpu.memory_space<vmem>>, vector<3x3x8xf32>
    %1 = vector.extract_strided_slice %0 {offsets = [0, 0, 0], sizes = [1, 1, 8], strides = [1, 1, 1]} : vector<3x3x8xf32> to vector<1x1x8xf32>
    %2 = vector.shape_cast %1 : vector<1x1x8xf32> to vector<8xf32>
    %3 = vector.shape_cast %2 : vector<8xf32> to vector<8x1xf32>
    %c0_2 = arith.constant 0 : index
    %c0_3 = arith.constant 0 : index
    %4 = vector.load %arg2[%c0_2, %c0_3] : memref<8x256xf32, #tpu.memory_space<vmem>>, vector<8x256xf32>
    %5 = vector.broadcast %3 : vector<8x1xf32> to vector<8x256xf32>
    %6 = arith.mulf %5, %4 : vector<8x256xf32>
    %7 = vector.extract_strided_slice %0 {offsets = [0, 1, 0], sizes = [1, 1, 8], strides = [1, 1, 1]} : vector<3x3x8xf32> to vector<1x1x8xf32>
    %8 = vector.shape_cast %7 : vector<1x1x8xf32> to vector<8xf32>
    %9 = vector.shape_cast %8 : vector<8xf32> to vector<8x1xf32>
    %c0_4 = arith.constant 0 : index
    %c0_5 = arith.constant 0 : index
    %10 = vector.load %arg3[%c0_4, %c0_5] : memref<8x256xf32, #tpu.memory_space<vmem>>, vector<8x256xf32>
    %11 = vector.broadcast %9 : vector<8x1xf32> to vector<8x256xf32>
    %12 = arith.mulf %11, %10 : vector<8x256xf32>
    %13 = arith.addf %6, %12 : vector<8x256xf32>
    %14 = vector.extract_strided_slice %0 {offsets = [0, 2, 0], sizes = [1, 1, 8], strides = [1, 1, 1]} : vector<3x3x8xf32> to vector<1x1x8xf32>
    %15 = vector.shape_cast %14 : vector<1x1x8xf32> to vector<8xf32>
    %16 = vector.shape_cast %15 : vector<8xf32> to vector<8x1xf32>
    %c0_6 = arith.constant 0 : index
    %c0_7 = arith.constant 0 : index
    %17 = vector.load %arg4[%c0_6, %c0_7] : memref<8x256xf32, #tpu.memory_space<vmem>>, vector<8x256xf32>
    %18 = vector.broadcast %16 : vector<8x1xf32> to vector<8x256xf32>
    %19 = arith.mulf %18, %17 : vector<8x256xf32>
    %20 = arith.addf %13, %19 : vector<8x256xf32>
    %c0_8 = arith.constant 0 : index
    %c0_9 = arith.constant 0 : index
    %21 = vector.load %arg5[%c0_8, %c0_9] : memref<8x256xf32, #tpu.memory_space<vmem>>, vector<8x256xf32>
    tpu.vector_store %arg5[%c0_8, %c0_9], %20 {strides = array<i32>} : memref<8x256xf32, #tpu.memory_space<vmem>>, vector<8x256xf32>,
    %22 = vector.extract_strided_slice %0 {offsets = [1, 0, 0], sizes = [1, 1, 8], strides = [1, 1, 1]} : vector<3x3x8xf32> to vector<1x1x8xf32>
    %23 = vector.shape_cast %22 : vector<1x1x8xf32> to vector<8xf32>
    %24 = vector.shape_cast %23 : vector<8xf32> to vector<8x1xf32>
    %c0_10 = arith.constant 0 : index
    %c0_11 = arith.constant 0 : index
    %25 = vector.load %arg2[%c0_10, %c0_11] : memref<8x256xf32, #tpu.memory_space<vmem>>, vector<8x256xf32>
    %26 = vector.broadcast %24 : vector<8x1xf32> to vector<8x256xf32>
    %27 = arith.mulf %26, %25 : vector<8x256xf32>
    %28 = vector.extract_strided_slice %0 {offsets = [1, 1, 0], sizes = [1, 1, 8], strides = [1, 1, 1]} : vector<3x3x8xf32> to vector<1x1x8xf32>
    %29 = vector.shape_cast %28 : vector<1x1x8xf32> to vector<8xf32>
    %30 = vector.shape_cast %29 : vector<8xf32> to vector<8x1xf32>
    %c0_12 = arith.constant 0 : index
    %c0_13 = arith.constant 0 : index
    %31 = vector.load %arg3[%c0_12, %c0_13] : memref<8x256xf32, #tpu.memory_space<vmem>>, vector<8x256xf32>
    %32 = vector.broadcast %30 : vector<8x1xf32> to vector<8x256xf32>
    %33 = arith.mulf %32, %31 : vector<8x256xf32>
    %34 = arith.addf %27, %33 : vector<8x256xf32>
    %35 = vector.extract_strided_slice %0 {offsets = [1, 2, 0], sizes = [1, 1, 8], strides = [1, 1, 1]} : vector<3x3x8xf32> to vector<1x1x8xf32>
    %36 = vector.shape_cast %35 : vector<1x1x8xf32> to vector<8xf32>
    %37 = vector.shape_cast %36 : vector<8xf32> to vector<8x1xf32>
    %c0_14 = arith.constant 0 : index
    %c0_15 = arith.constant 0 : index
    %38 = vector.load %arg4[%c0_14, %c0_15] : memref<8x256xf32, #tpu.memory_space<vmem>>, vector<8x256xf32>
    %39 = vector.broadcast %37 : vector<8x1xf32> to vector<8x256xf32>
    %40 = arith.mulf %39, %38 : vector<8x256xf32>
    %41 = arith.addf %34, %40 : vector<8x256xf32>
    %c0_16 = arith.constant 0 : index
    %c0_17 = arith.constant 0 : index
    %42 = vector.load %arg6[%c0_16, %c0_17] : memref<8x256xf32, #tpu.memory_space<vmem>>, vector<8x256xf32>
    tpu.vector_store %arg6[%c0_16, %c0_17], %41 {strides = array<i32>} : memref<8x256xf32, #tpu.memory_space<vmem>>, vector<8x256xf32>,
    %43 = vector.extract_strided_slice %0 {offsets = [2, 0, 0], sizes = [1, 1, 8], strides = [1, 1, 1]} : vector<3x3x8xf32> to vector<1x1x8xf32>
    %44 = vector.shape_cast %43 : vector<1x1x8xf32> to vector<8xf32>
    %45 = vector.shape_cast %44 : vector<8xf32> to vector<8x1xf32>
    %c0_18 = arith.constant 0 : index
    %c0_19 = arith.constant 0 : index
    %46 = vector.load %arg2[%c0_18, %c0_19] : memref<8x256xf32, #tpu.memory_space<vmem>>, vector<8x256xf32>
    %47 = vector.broadcast %45 : vector<8x1xf32> to vector<8x256xf32>
    %48 = arith.mulf %47, %46 : vector<8x256xf32>
    %49 = vector.extract_strided_slice %0 {offsets = [2, 1, 0], sizes = [1, 1, 8], strides = [1, 1, 1]} : vector<3x3x8xf32> to vector<1x1x8xf32>
    %50 = vector.shape_cast %49 : vector<1x1x8xf32> to vector<8xf32>
    %51 = vector.shape_cast %50 : vector<8xf32> to vector<8x1xf32>
    %c0_20 = arith.constant 0 : index
    %c0_21 = arith.constant 0 : index
    %52 = vector.load %arg3[%c0_20, %c0_21] : memref<8x256xf32, #tpu.memory_space<vmem>>, vector<8x256xf32>
    %53 = vector.broadcast %51 : vector<8x1xf32> to vector<8x256xf32>
    %54 = arith.mulf %53, %52 : vector<8x256xf32>
    %55 = arith.addf %48, %54 : vector<8x256xf32>
    %56 = vector.extract_strided_slice %0 {offsets = [2, 2, 0], sizes = [1, 1, 8], strides = [1, 1, 1]} : vector<3x3x8xf32> to vector<1x1x8xf32>
    %57 = vector.shape_cast %56 : vector<1x1x8xf32> to vector<8xf32>
    %58 = vector.shape_cast %57 : vector<8xf32> to vector<8x1xf32>
    %c0_22 = arith.constant 0 : index
    %c0_23 = arith.constant 0 : index
    %59 = vector.load %arg4[%c0_22, %c0_23] : memref<8x256xf32, #tpu.memory_space<vmem>>, vector<8x256xf32>
    %60 = vector.broadcast %58 : vector<8x1xf32> to vector<8x256xf32>
    %61 = arith.mulf %60, %59 : vector<8x256xf32>
    %62 = arith.addf %55, %61 : vector<8x256xf32>
    %c0_24 = arith.constant 0 : index
    %c0_25 = arith.constant 0 : index
    %63 = vector.load %arg7[%c0_24, %c0_25] : memref<8x256xf32, #tpu.memory_space<vmem>>, vector<8x256xf32>
    tpu.vector_store %arg7[%c0_24, %c0_25], %62 {strides = array<i32>} : memref<8x256xf32, #tpu.memory_space<vmem>>, vector<8x256xf32>,
    return
  }
  func.func @transform_0(%arg0: i32) -> (i32, i32, i32) {
    %c0_i32 = arith.constant 0 : i32
    %c0_i32_0 = arith.constant 0 : i32
    %c0_i32_1 = arith.constant 0 : i32
    %c0_i32_2 = arith.constant 0 : i32
    return %c0_i32, %c0_i32_0, %c0_i32_1 : i32, i32, i32
  }
  func.func @transform_1(%arg0: i32) -> (i32, i32) {
    %c0_i32 = arith.constant 0 : i32
    %c0_i32_0 = arith.constant 0 : i32
    return %c0_i32, %arg0 : i32, i32
  }
  func.func @transform_2(%arg0: i32) -> (i32, i32) {
    %c0_i32 = arith.constant 0 : i32
    %c0_i32_0 = arith.constant 0 : i32
    return %c0_i32, %arg0 : i32, i32
  }
  func.func @transform_3(%arg0: i32) -> (i32, i32) {
    %c0_i32 = arith.constant 0 : i32
    %c0_i32_0 = arith.constant 0 : i32
    return %c0_i32, %arg0 : i32, i32
  }
  func.func @transform_4(%arg0: i32) -> (i32, i32) {
    %c0_i32 = arith.constant 0 : i32
    %c0_i32_0 = arith.constant 0 : i32
    return %c0_i32, %arg0 : i32, i32
  }
  func.func @transform_5(%arg0: i32) -> (i32, i32) {
    %c0_i32 = arith.constant 0 : i32
    %c0_i32_0 = arith.constant 0 : i32
    return %c0_i32, %arg0 : i32, i32
  }
  func.func @transform_6(%arg0: i32) -> (i32, i32) {
    %c0_i32 = arith.constant 0 : i32
    %c0_i32_0 = arith.constant 0 : i32
    return %c0_i32, %arg0 : i32, i32
  }
}

</mosaic_0001>

<bundles_post_ra>
// kernel: tpu_custom_call.1
= control target key start
LH: loop header
LB: loop body
LE: loop exit
PB: predicated region body
PF: predicated region fallthrough
CT: control target
= control target key end

     0   :  { %12 = vsyncpa [#allocation3], 0  ;;  %s504_s0 = inlined_call_operand.hbm [shape: f32[3,3,8], index: 0, kind: input, shape index: {}]   ;;  %s505_s1 = inlined_call_operand.hbm [shape: f32[8,256], index: 1, kind: input, shape index: {}]   ;;  %s506_s2 = inlined_call_operand.hbm [shape: f32[8,256], index: 2, kind: input, shape index: {}]   ;;  %s507_s3 = inlined_call_operand.hbm [shape: f32[8,256], index: 3, kind: input, shape index: {}]   ;;  %s508_s4 = inlined_call_operand.hbm [shape: f32[8,256], index: 4, kind: output, shape index: {0}]   ;;  %s509_s5 = inlined_call_operand.hbm [shape: f32[8,256], index: 5, kind: output, shape index: {1}]   ;;  %s510_s6 = inlined_call_operand.hbm [shape: f32[8,256], index: 6, kind: output, shape index: {2}]  }
   0x1   :  { %13 = vsyncpa [#allocation6], 0 }
   0x2   :  { %14 = vsyncpa [#allocation9], 0 }
   0x3   :  { %15 = vsyncpa [#allocation4], 0  ;;  %s35_s23 = sshll.u32 %s505_s1, 4  ;;  %s36_s23 = int_to_ptr.hbm [resolvable:$true] %s35_s23 }
   0x4   :  { %16 = vsyncpa [#allocation12], 0  ;;  %s439_s24 = smov [#allocation5]   ;;  %s21_s28 = sshll.u32 %s504_s0, 4  ;;  %s22_s28 = int_to_ptr.hbm [resolvable:$true] %s21_s28 }
   0x5   :  { %s37_s25 = sshll.u32 %s439_s24, 4  ;;  %s440_s29 = smov [#allocation2]   ;;  %s38_s25 = int_to_ptr.vmem [resolvable:$true] %s37_s25 }
   0x6   :  { %40 = dma.hbm_to_vmem [thread:$0]  %s36_s23, 256, %s38_s25, [#allocation6]  }
   0x7   :  { %s23_s30 = sshll.u32 %s440_s29, 4  ;;  %s441_s7 = smov 64   ;;  %s24_s30 = int_to_ptr.vmem [resolvable:$true] %s23_s30 }
   0x8   :  { %s442_s8 = smov 4   ;;  %s46_s1 = sshll.u32 %s506_s2, 4  ;;  %s47_s1 = int_to_ptr.hbm [resolvable:$true] %s46_s1 }
   0x9   :  { %29 = dma.hbm_to_vmem [thread:$0]  %s22_s28, 192, %s24_s30, [#allocation3], %s441_s7, %s441_s7, %s442_s8  }
   0xa   :  { %s443_s11 = smov [#allocation7]   ;;  %s57_s0 = sshll.u32 %s507_s3, 4  ;;  %s58_s0 = int_to_ptr.hbm [resolvable:$true] %s57_s0 }
   0xb   :  { %s48_s12 = sshll.u32 %s443_s11, 4  ;;  %s444_s15 = smov [#allocation8]   ;;  %s49_s12 = int_to_ptr.vmem [resolvable:$true] %s48_s12 }
   0xc   :  { %51 = dma.hbm_to_vmem [thread:$0]  %s47_s1, 256, %s49_s12, [#allocation6]  }
   0xd   :  { %s59_s16 = sshll.u32 %s444_s15, 4  ;;  %s60_s16 = int_to_ptr.vmem [resolvable:$true] %s59_s16 }
   0xe   :  { %62 = dma.hbm_to_vmem [thread:$0]  %s58_s0, 256, %s60_s16, [#allocation9]  }
   0xf   :  { %429 = dma.done.wait [#allocation3], 192  }
  0x10   :  { %430 = vsyncadd [#allocation3], 4294967104 }
  0x11   :  { %431 = dma.done.wait [#allocation6], 512  }
  0x12   :  { %432 = vsyncadd [#allocation6], 4294966784 }
  0x13   :  { %433 = dma.done.wait [#allocation9], 256  }
  0x14   :  { %434 = vsyncadd [#allocation9], 4294967040  ;;  %v83_v0 = vlaneseq  ;;  %v80_v2 = vld [vmem:[#allocation2 + $0x4] sm:$0x7]  ;;  %v79_v3 = vld [vmem:[#allocation2] sm:$0x7] }
  0x15   :  { %v81_v4 = vld [vmem:[#allocation2 + $0x8] sm:$0x7]  ;;  %v121_v5 = vperm.slane %v80_v2, 0  ;;  %v82_v6 = vperm.slane %v79_v3, 0  ;;  %v132_v8 = vperm.slane %v80_v2, 1  ;;  %v93_v9 = vperm.slane %v79_v3, 1 }
  0x16   :  { %v84_v1 = vshrl.u32 %v83_v0, 7  ;;  %v160_v7 = vperm.slane %v81_v4, 0  ;;  %v171_v10 = vperm.slane %v81_v4, 1  ;;  %v106_v11 = vperm.slane %v79_v3, 2  ;;  %v167_v15 = vld [vmem:[#allocation5] sm:$0xff]  ;;  %v168_v16 = vld [vmem:[#allocation5 + $0x8] sm:$0xff] }
  0x17   :  { %v145_v12 = vperm.slane %v80_v2, 2  ;;  %v184_v13 = vperm.slane %v81_v4, 2  ;;  %v178_v17 = vld [vmem:[#allocation7] sm:$0xff]  ;;  %v179_v18 = vld [vmem:[#allocation7 + $0x8] sm:$0xff]  ;;  %v191_v24 = vld [vmem:[#allocation8] sm:$0xff]  ;;  %s445_s2 = smov [#allocation10]  }
  0x18   :  { %259 = vset.pattern.permute.xlu1 %v84_v1  ;;  %258 = vset.pattern.permute.xlu0 %v84_v1  ;;  %v192_v25 = vld [vmem:[#allocation8 + $0x8] sm:$0xff]  ;;  %s204_s3 = sshll.u32 %s445_s2, 4  ;;  %s206_s19 = sshll.u32 %s508_s4, 4  ;;  %s205_s3 = int_to_ptr.vmem [resolvable:$true] %s204_s3  ;;  %s207_s19 = int_to_ptr.hbm [resolvable:$true] %s206_s19 }
  0x19   :  { %260 = vset.pattern.permute.xlu2 %v84_v1  ;;  %s446_s20 = smov [#allocation11]   ;;  %s217_s24 = sshll.u32 %s509_s5, 4  ;;  %s218_s24 = int_to_ptr.hbm [resolvable:$true] %s217_s24 }
  0x1a   :  { %s215_s21 = sshll.u32 %s446_s20, 4  ;;  %s447_s25 = smov [#allocation13]   ;;  %s216_s21 = int_to_ptr.vmem [resolvable:$true] %s215_s21 }
  0x1b   :  { %s226_s26 = sshll.u32 %s447_s25, 4  ;;  %s228_s29 = sshll.u32 %s510_s6, 4  ;;  %s227_s26 = int_to_ptr.vmem [resolvable:$true] %s226_s26  ;;  %s229_s29 = int_to_ptr.hbm [resolvable:$true] %s228_s29 }
  0x20   :  { %126 = vperm.xlu1 %259, %v121_v5   ;;  %87 = vperm.xlu0 %258, %v82_v6  }
  0x21   :  { %165 = vperm.xlu2 %260, %v160_v7  }
  0x28   :  { %137 = vperm.xlu1 %259, %v132_v8   ;;  %98 = vperm.xlu0 %258, %v93_v9  }
  0x29   :  { %176 = vperm.xlu2 %260, %v171_v10  }
  0x30   :  { %111 = vperm.xlu1 %259, %v106_v11   ;;  %150 = vperm.xlu0 %258, %v145_v12  }
  0x31   :  { %189 = vperm.xlu2 %260, %v184_v13  }
  0x7b   :  { %v166_v14 = vpop.permute.xlu2 %165 }
  0x7c   :  { %v169_v20 = vmul.f32 %v167_v15, %v166_v14  ;;  %v170_v21 = vmul.f32 %v168_v16, %v166_v14 }
  0x83   :  { %v177_v19 = vpop.permute.xlu2 %176 }
  0x84   :  { %v180_v22 = vmul.f32 %v178_v17, %v177_v19  ;;  %v181_v23 = vmul.f32 %v179_v18, %v177_v19 }
  0x86   :  { %v182_v26 = vadd.f32 %v180_v22, %v169_v20  ;;  %v183_v27 = vadd.f32 %v181_v23, %v170_v21 }
  0x8b   :  { %v190_v28 = vpop.permute.xlu2 %189 }
  0x8c   :  { %v193_v29 = vmul.f32 %v191_v24, %v190_v28  ;;  %v194_v30 = vmul.f32 %v192_v25, %v190_v28 }
  0x8e   :  { %v195_v31 = vadd.f32 %v193_v29, %v182_v26  ;;  %v196_v32 = vadd.f32 %v194_v30, %v183_v27 }
  0x90   :  { %197 = vst [vmem:[#allocation13] sm:$0xff] %v195_v31 }
  0x91   :  { %198 = vst [vmem:[#allocation13 + $0x8] sm:$0xff] %v196_v32 }
  0x92   :  { %v127_v33 = vpop.permute.xlu1 %126  ;;  %v88_v34 = vpop.permute.xlu0 %87 }
  0x93   :  { %v130_v40 = vmul.f32 %v167_v15, %v127_v33  ;;  %v91_v41 = vmul.f32 %v167_v15, %v88_v34  ;;  %v92_v42 = vmul.f32 %v168_v16, %v88_v34  ;;  %v131_v44 = vmul.f32 %v168_v16, %v127_v33 }
  0x9a   :  { %v138_v35 = vpop.permute.xlu1 %137  ;;  %v99_v36 = vpop.permute.xlu0 %98 }
  0x9b   :  { %v141_v37 = vmul.f32 %v178_v17, %v138_v35  ;;  %v102_v38 = vmul.f32 %v178_v17, %v99_v36  ;;  %v103_v39 = vmul.f32 %v179_v18, %v99_v36  ;;  %v142_v43 = vmul.f32 %v179_v18, %v138_v35 }
  0x9d   :  { %v143_v45 = vadd.f32 %v141_v37, %v130_v40  ;;  %v104_v46 = vadd.f32 %v102_v38, %v91_v41  ;;  %v105_v47 = vadd.f32 %v103_v39, %v92_v42  ;;  %v144_v54 = vadd.f32 %v142_v43, %v131_v44 }
  0xa2   :  { %v112_v48 = vpop.permute.xlu1 %111  ;;  %v151_v49 = vpop.permute.xlu0 %150 }
  0xa3   :  { %v115_v50 = vmul.f32 %v191_v24, %v112_v48  ;;  %v116_v51 = vmul.f32 %v192_v25, %v112_v48  ;;  %v154_v52 = vmul.f32 %v191_v24, %v151_v49  ;;  %v155_v53 = vmul.f32 %v192_v25, %v151_v49 }
  0xa5   :  { %v117_v55 = vadd.f32 %v115_v50, %v104_v46  ;;  %v118_v56 = vadd.f32 %v116_v51, %v105_v47  ;;  %v156_v57 = vadd.f32 %v154_v52, %v143_v45  ;;  %v157_v58 = vadd.f32 %v155_v53, %v144_v54 }
  0xa7   :  { %119 = vst [vmem:[#allocation10] sm:$0xff] %v117_v55 }
  0xa8   :  { %120 = vst [vmem:[#allocation10 + $0x8] sm:$0xff] %v118_v56 }
  0xa9   :  { %158 = vst [vmem:[#allocation11] sm:$0xff] %v156_v57  ;;  %209 = dma.vmem_to_hbm [thread:$0]  %s205_s3, 256, %s207_s19, [#allocation4]  }
  0xaa   :  { %159 = vst [vmem:[#allocation11 + $0x8] sm:$0xff] %v157_v58 }
  0xab   :  { %220 = dma.vmem_to_hbm [thread:$0]  %s216_s21, 256, %s218_s24, [#allocation12]  }
  0xac   :  { %231 = dma.vmem_to_hbm [thread:$0]  %s227_s26, 256, %s229_s29, [#allocation12]  }
  0xad   :  { %435 = dma.done.wait [#allocation4], 256  }
  0xae   :  { %436 = vsyncadd [#allocation4], 4294967040 }
  0xaf   :  { %437 = dma.done.wait [#allocation12], 512  }
  0xb0   :  { %438 = vsyncadd [#allocation12], 4294966784 }
  0xb1   :  { %244 = vsyncpa [#allocation3], 1 }
  0xb2   :  { %245 = vsyncpa [#allocation6], 1 }
  0xb3   :  { %246 = vsyncpa [#allocation9], 1 }
  0xb4   :  { %247 = vsyncpa [#allocation4], 1 }
  0xb5   :  { %248 = vsyncpa [#allocation12], 1 }

</bundles_post_ra>
